<compile_context>
chip_gen: v5e
topology: v5e:2x2
jax: 0.10.0
libtpu: 0.0.40
codegen_flags: <defaults>
</compile_context>

<pallas_src>
import jax
import jax.numpy as jnp
from jax import lax
from jax.experimental import pallas as pl
from jax.experimental.pallas import tpu as pltpu


def _cdiv(a, b):
    return (a + b - 1) // b


def _round_up(x, m):
    return ((x + m - 1) // m) * m


# -----------------------------------------------------------------------------
# Kernels
# -----------------------------------------------------------------------------
def _linear_small_kernel(x_ref, w_ref, b_ref, o_ref):
    # Whole problem in one VMEM block: no grid, no K loop, no scratch.
    o_ref[...] = (
        lax.dot_general(
            x_ref[...], w_ref[...],
            dimension_numbers=(((1,), (1,)), ((), ())),   # x @ W.T
            preferred_element_type=jnp.float32,
        ) + b_ref[...]
    ).astype(o_ref.dtype)


def _linear_kernel_f32out(x_ref, w_ref, b_ref, o_ref):
    # f32 output: accumulate straight into the resident output tile
    # (out index_map ignores k), no scratch needed.
    @pl.when(pl.program_id(2) == 0)
    def _():
        o_ref[...] = jnp.zeros_like(o_ref)

    o_ref[...] += lax.dot_general(
        x_ref[...], w_ref[...],
        dimension_numbers=(((1,), (1,)), ((), ())),       # contract K of both
        preferred_element_type=jnp.float32)

    @pl.when(pl.program_id(2) == pl.num_programs(2) - 1)
    def _():
        o_ref[...] += b_ref[...]                          # bias exactly once


def _linear_kernel_acc(x_ref, w_ref, b_ref, o_ref, acc_ref):
    # Generic-output-dtype variant: f32 VMEM accumulator + cast epilogue.
    @pl.when(pl.program_id(2) == 0)
    def _():
        acc_ref[...] = jnp.zeros_like(acc_ref)

    acc_ref[...] += lax.dot_general(
        x_ref[...], w_ref[...],
        dimension_numbers=(((1,), (1,)), ((), ())),
        preferred_element_type=jnp.float32)

    @pl.when(pl.program_id(2) == pl.num_programs(2) - 1)
    def _():
        o_ref[...] = (acc_ref[...] + b_ref[...]).astype(o_ref.dtype)


# -----------------------------------------------------------------------------
# Wrapper
# -----------------------------------------------------------------------------
def _balanced_tile(dim, tile_max, align):
    """Largest aligned tile <= tile_max that splits `dim` into even pieces."""
    n_tiles = max(1, _cdiv(dim, tile_max))
    return max(align, min(tile_max, _round_up(_cdiv(dim, n_tiles), align)))


def linear_forward(x, weight, bias, *, tm=512, tn=512, tk=1024):
    """y = x @ weight.T + bias, matching torch.nn.Linear semantics.

    x:      (M, K)
    weight: (N, K)   (PyTorch nn.Linear layout -- never transposed in HBM)
    bias:   (N,)
    """
    M, K = x.shape
    N, Kw = weight.shape
    assert K == Kw and bias.shape == (N,)

    out_dtype = x.dtype
    b2d = bias.reshape(1, N).astype(jnp.float32)

    # ---- Fast path: tiny problem -> single block, no grid / padding / scratch.
    if M <= 256 and N <= 256 and K <= 512:
        return pl.pallas_call(
            _linear_small_kernel,
            out_shape=jax.ShapeDtypeStruct((M, N), out_dtype),
        )(x, weight, b2d)

    # ---- Tiled path (P1 + P3) ----
    itemsize = jnp.dtype(x.dtype).itemsize
    sub_align = {4: 8, 2: 16, 1: 32}.get(itemsize, 8)    # dtype-aware sublanes

    tm = _balanced_tile(M, tm, sub_align)
    tn = _balanced_tile(N, tn, 128)                      # lane-dense output
    tk = _balanced_tile(K, tk, 128)                      # lane-dense contraction

    # v7x has 2 TensorCores: make sure the parallel (M, N) grid has >= 2 blocks.
    if _cdiv(M, tm) * _cdiv(N, tn) < 2:
        if tn > 128:
            tn = _round_up(_cdiv(tn, 2), 128)
        elif tm > sub_align:
            tm = _round_up(_cdiv(tm, 2), sub_align)

    # Only K-padding is correctness-critical (Pallas does not zero-fill OOB
    # input reads along the contraction).  M/N remainders are handled by
    # partial edge blocks (OOB output stores are dropped) -> no full-array pad.
    Kp = _round_up(K, tk)
    x_p = x if Kp == K else jnp.pad(x, ((0, 0), (0, Kp - K)))
    w_p = weight if Kp == K else jnp.pad(weight, ((0, 0), (0, Kp - K)))

    grid = (_cdiv(M, tm), _cdiv(N, tn), Kp // tk)        # reduction axis last

    direct_acc = (out_dtype == jnp.float32)
    kernel = _linear_kernel_f32out if direct_acc else _linear_kernel_acc
    scratch = [] if direct_acc else [pltpu.VMEM((tm, tn), jnp.float32)]

    # VMEM budget: double-buffered x/W tiles + output tile(s); cap < v7x's
    # 64 MiB physical, floor at the common 32 MiB scoped default.
    tile_bytes = (2 * (tm * tk + tn * tk) * itemsize
                  + 2 * tm * tn * 4 + 2 * tn * 4)
    vmem_limit = max(32 << 20, min(int(1.5 * tile_bytes) + (4 << 20), 56 << 20))

    return pl.pallas_call(
        kernel,
        out_shape=jax.ShapeDtypeStruct((M, N), out_dtype),
        grid_spec=pltpu.PrefetchScalarGridSpec(
            num_scalar_prefetch=0,
            grid=grid,
            in_specs=[
                pl.BlockSpec((tm, tk), lambda i, j, k: (i, k)),   # x
                pl.BlockSpec((tn, tk), lambda i, j, k: (j, k)),   # W (N, K)
                pl.BlockSpec((1, tn), lambda i, j, k: (0, j)),    # bias
            ],
            out_specs=pl.BlockSpec((tm, tn), lambda i, j, k: (i, j)),
            scratch_shapes=scratch,
        ),
        compiler_params=pltpu.CompilerParams(
            dimension_semantics=("parallel", "parallel", "arbitrary"),
            vmem_limit_bytes=vmem_limit),
    )(x_p, w_p, b2d)


if __name__ == "__main__":
    key = jax.random.PRNGKey(0)
    kx, kw, kb, k2 = jax.random.split(key, 4)

    # --- Demo shape implied by the module: batch=8, input_dim=32, output_dim=16
    batch, input_dim, output_dim = 8, 32, 16
    x = jax.random.normal(kx, (batch, input_dim), dtype=jnp.float32)
    bound = 1.0 / jnp.sqrt(jnp.float32(input_dim))
    weight = jax.random.uniform(kw, (output_dim, input_dim),
                                minval=-bound, maxval=bound, dtype=jnp.float32)
    bias = jax.random.uniform(kb, (output_dim,),
                              minval=-bound, maxval=bound, dtype=jnp.float32)

    y = linear_forward(x, weight, bias)          # fast path (single block)
    jax.block_until_ready(y)
    y_ref = x @ weight.T + bias
    assert y.shape == (batch, output_dim)
    assert jnp.allclose(y, y_ref, atol=1e-5, rtol=1e-5)

    # --- Exercise the tiled path: K accumulation + partial M/N edge blocks ---
    M2, Kd2, N2 = 200, 640, 272
    kx2, kw2, kb2 = jax.random.split(k2, 3)
    x2 = jax.random.normal(kx2, (M2, Kd2), dtype=jnp.float32)
    w2 = jax.random.normal(kw2, (N2, Kd2), dtype=jnp.float32) * 0.05
    b2 = jax.random.normal(kb2, (N2,), dtype=jnp.float32)

    y2 = linear_forward(x2, w2, b2, tm=128, tn=128, tk=256)
    jax.block_until_ready(y2)
    y2_ref = x2 @ w2.T + b2
    assert y2.shape == (M2, N2)
    assert jnp.allclose(y2, y2_ref, atol=2e-3, rtol=2e-3)

    print("KERNEL_OK")
</pallas_src>

<mosaic_0001>
module attributes {stable_mosaic.version = 11 : i64} {
  func.func @_linear_small_kernel(%arg0: memref<8x32xf32, #tpu.memory_space<vmem>>, %arg1: memref<16x32xf32, #tpu.memory_space<vmem>>, %arg2: memref<1x16xf32, #tpu.memory_space<vmem>>, %arg3: memref<8x16xf32, #tpu.memory_space<vmem>>) attributes {dimension_semantics = [], scalar_prefetch = 0 : i64, scratch_operands = 0 : i64, tpu.core_type = #tpu.core_type<tc>} {
    %c0 = arith.constant 0 : index
    %c0_0 = arith.constant 0 : index
    %0 = vector.load %arg0[%c0, %c0_0] : memref<8x32xf32, #tpu.memory_space<vmem>>, vector<8x32xf32>
    %c0_1 = arith.constant 0 : index
    %c0_2 = arith.constant 0 : index
    %1 = vector.load %arg1[%c0_1, %c0_2] : memref<16x32xf32, #tpu.memory_space<vmem>>, vector<16x32xf32>
    %cst = arith.constant dense<0.000000e+00> : vector<8x16xf32>
    %2 = tpu.matmul %0, %1, %cst {dimension_numbers = #tpu.dot_dimension_numbers<[1], [1], [0], [0], [0, 0, 1, 0], [], []>} : vector<8x32xf32>, vector<16x32xf32>, vector<8x16xf32> -> vector<8x16xf32>
    %c0_3 = arith.constant 0 : index
    %c0_4 = arith.constant 0 : index
    %3 = vector.load %arg2[%c0_3, %c0_4] : memref<1x16xf32, #tpu.memory_space<vmem>>, vector<1x16xf32>
    %4 = vector.broadcast %3 : vector<1x16xf32> to vector<8x16xf32>
    %5 = arith.addf %2, %4 : vector<8x16xf32>
    %c0_5 = arith.constant 0 : index
    %c0_6 = arith.constant 0 : index
    %6 = vector.load %arg3[%c0_5, %c0_6] : memref<8x16xf32, #tpu.memory_space<vmem>>, vector<8x16xf32>
    tpu.vector_store %arg3[%c0_5, %c0_6], %5 {strides = array<i32>} : memref<8x16xf32, #tpu.memory_space<vmem>>, vector<8x16xf32>,
    return
  }
}

</mosaic_0001>

<bundles_post_ra>
// kernel: tpu_custom_call.1
= control target key start
LH: loop header
LB: loop body
LE: loop exit
PB: predicated region body
PF: predicated region fallthrough
CT: control target
= control target key end

     0   :  { %8 = vsyncpa [#allocation3], 0  ;;  %s226_s0 = inlined_call_operand.hbm [shape: f32[8,32], index: 0, kind: input, shape index: {}]   ;;  %s227_s1 = inlined_call_operand.hbm [shape: f32[16,32], index: 1, kind: input, shape index: {}]   ;;  %s228_s2 = inlined_call_operand.vmem [shape: f32[1,16], index: 2, kind: input, shape index: {}]   ;;  %s229_s3 = inlined_call_operand.hbm [shape: f32[8,16], index: 3, kind: output, shape index: {}]  }
   0x1   :  { %9 = vsyncpa [#allocation6], 0 }
   0x2   :  { %10 = vsyncpa [#allocation4], 0  ;;  %s16_s14 = sshll.u32 %s226_s0, 4  ;;  %s189_s15 = smov [#allocation2]   ;;  %s17_s14 = int_to_ptr.hbm [resolvable:$true] %s16_s14 }
   0x3   :  { %s18_s16 = sshll.u32 %s189_s15, 4  ;;  %s26_s19 = sshll.u32 %s227_s1, 4  ;;  %s19_s16 = int_to_ptr.vmem [resolvable:$true] %s18_s16  ;;  %s27_s19 = int_to_ptr.hbm [resolvable:$true] %s26_s19 }
   0x4   :  { %21 = dma.hbm_to_vmem [thread:$0]  %s17_s14, 128, %s19_s16, [#allocation3]  }
   0x5   :  { %s190_s20 = smov [#allocation5]   ;;  %s191_s22 = smov 128  }
   0x6   :  { %s28_s21 = sshll.u32 %s190_s20, 4  ;;  %s192_s23 = smov 8   ;;  %s29_s21 = int_to_ptr.vmem [resolvable:$true] %s28_s21 }
   0x7   :  { %34 = dma.hbm_to_vmem [thread:$0]  %s27_s19, 256, %s29_s21, [#allocation6], %s191_s22, %s191_s22, %s192_s23  }
   0x8   :  { %183 = dma.done.wait [#allocation3], 128  }
   0x9   :  { %184 = vsyncadd [#allocation3], 4294967168 }
   0xa   :  { %185 = dma.done.wait [#allocation6], 256  }
   0xb   :  { %186 = vsyncadd [#allocation6], 4294967040  ;;  %vm52_vm0 = vcmask 261120   ;;  %v47_v0 = vld [vmem:[#allocation5 + $0x8] sm:$0xff]  ;;  %v46_v1 = vld [vmem:[#allocation5] sm:$0xff]  ;;  %s193_s24 = smov [#allocation7]  }
   0xc   :  { %102 = vmatpush.xpose.msk.msra.mxu0 %vm52_vm0, %v47_v0  ;;  %v45_v2 = vld [vmem:[#allocation2] sm:$0xff]  ;;  %s89_s25 = sshll.u32 %s193_s24, 4  ;;  %s91_s28 = sshll.u32 %s229_s3, 4  ;;  %vm82_vm1 = vcmask 130048   ;;  %s90_s25 = int_to_ptr.vmem [resolvable:$true] %s89_s25  ;;  %s92_s28 = int_to_ptr.hbm [resolvable:$true] %s91_s28 }
   0xd   :  { %v110_v3 = vld [vmem:[%s228_s2] ss:$0 sm:$0xff] }
  0x10   :  { %103 = vmatpush.xpose.msk.msra.mxu0 %vm52_vm0, %v46_v1 }
  0x13   :  { %104 = vmatmul.msk.f32.vlgmr.msra.gmra.mxu0 %vm52_vm0, %v45_v2 }
  0x90   :  { %v79_v4 = vpop.f32.mrf.mxu0 }
  0x91   :  { %v80_v5 = vadd.f32 %v110_v3, %v79_v4 }
  0x93   :  { %83 = vst.msk [vmem:[#allocation7] sm:$0xff] %vm82_vm1, %v80_v5 }
  0x94   :  { %94 = dma.vmem_to_hbm [thread:$0]  %s90_s25, 128, %s92_s28, [#allocation4]  }
  0x95   :  { %187 = dma.done.wait [#allocation4], 128  }
  0x96   :  { %188 = vsyncadd [#allocation4], 4294967168 }
  0x97   :  { %99 = vsyncpa [#allocation3], 1 }
  0x98   :  { %100 = vsyncpa [#allocation6], 1 }
  0x99   :  { %101 = vsyncpa [#allocation4], 1 }

</bundles_post_ra>
